<compile_context>
chip_gen: v5e
topology: v5e:2x2
jax: 0.10.0
libtpu: 0.0.40
codegen_flags: <defaults>
</compile_context>

<pallas_src>
import jax
import jax.numpy as jnp
from jax.experimental import pallas as pl
from jax.experimental.pallas import tpu as pltpu

EPS = 1e-06


def _gem_kernel(p_ref, x_ref, o_ref):
    # p_ref : SMEM (1,)              -- trainable GeM exponent p (scalar prefetch)
    # x_ref : VMEM (TILE_NC, HW)     -- one row tile of the flattened input
    # o_ref : VMEM (TILE_NC, 1)      -- per-row pooled result
    p = p_ref[0]
    inv_p = 1.0 / p                                # hoisted once per tile

    x = x_ref[...].astype(jnp.float32)             # upcast only in VMEM
    x = jnp.maximum(x, EPS)                        # clamp(min=eps)  -> x > 0
    xp = jnp.exp(p * jnp.log(x))                   # x ** p   (EUP log + exp)
    m = jnp.mean(xp, axis=-1, keepdims=True)       # avg_pool2d over full (H, W)
    y = jnp.exp(jnp.log(m) * inv_p)                # m ** (1/p)   (m > 0)
    o_ref[...] = y.astype(o_ref.dtype)


def gem_pallas(x, p):
    """x: (N, C, H, W) array; p: scalar (trainable exponent). Returns (N, C, 1, 1)."""
    N, C, H, W = x.shape
    NC = N * C
    HW = H * W
    x2d = x.reshape(NC, HW)

    itemsize = jnp.dtype(x.dtype).itemsize
    # Sublane packing granularity for the row (second-to-last) block dim.
    sub = 8 if itemsize >= 4 else (16 if itemsize == 2 else 32)

    # Row-tile size: target ~4 MiB per input buffer (2x for double-buffering
    # stays well under the scoped VMEM limit on v5e/v6e/v7x alike), multiple
    # of `sub`, capped so tiny inputs are not over-padded.
    target_bytes = 4 << 20
    tile_nc = max(sub, (target_bytes // max(1, HW * itemsize)) // sub * sub)
    tile_nc = min(tile_nc, 1024)                       # per-step overhead amortized
    tile_nc = min(tile_nc, pl.cdiv(NC, sub) * sub)     # don't exceed (padded) NC

    nc_pad = pl.cdiv(NC, tile_nc) * tile_nc
    if nc_pad != NC:
        # Padded rows are computed on benign data and discarded afterwards.
        x2d = jnp.pad(x2d, ((0, nc_pad - NC), (0, 0)), constant_values=1.0)
    num_tiles = nc_pad // tile_nc

    p_arr = jnp.asarray(p, dtype=jnp.float32).reshape(1)

    out2d = pl.pallas_call(
        _gem_kernel,
        out_shape=jax.ShapeDtypeStruct((nc_pad, 1), x.dtype),
        grid_spec=pltpu.PrefetchScalarGridSpec(
            num_scalar_prefetch=1,
            grid=(num_tiles,),
            # index_maps receive the scalar-prefetch ref as a trailing arg.
            in_specs=[pl.BlockSpec((tile_nc, HW), lambda i, p_ref: (i, 0))],
            out_specs=pl.BlockSpec((tile_nc, 1), lambda i, p_ref: (i, 0)),
        ),
        compiler_params=pltpu.CompilerParams(
            # Row tiles are independent -> shard across the 2 TCs on v7x;
            # harmless no-op on v5e/v6e.
            dimension_semantics=("parallel",),
            vmem_limit_bytes=32 * 1024 * 1024,
        ),
    )(p_arr, x2d)

    return out2d[:NC].reshape(N, C, 1, 1)


if __name__ == "__main__":
    key = jax.random.PRNGKey(0)
    N, C, H, W = 2, 4, 16, 16
    x = jax.random.uniform(key, (N, C, H, W), dtype=jnp.float32)

    # Deterministic parameter init, matching nn.Parameter(torch.ones(1) * 3)
    p = jnp.ones((1,), dtype=jnp.float32) * 3.0

    y = gem_pallas(x, p)
    jax.block_until_ready(y)

    # Reference check (plain JAX)
    ref = jnp.mean(jnp.maximum(x, EPS) ** p[0], axis=(-2, -1), keepdims=True) ** (1.0 / p[0])
    assert y.shape == (N, C, 1, 1)
    assert jnp.allclose(y, ref, rtol=1e-4, atol=1e-5), (y, ref)

    print("KERNEL_OK")
</pallas_src>

<mosaic_0001>
module attributes {stable_mosaic.version = 11 : i64} {
  func.func @_gem_kernel(%arg0: i32, %arg1: memref<1xf32, #tpu.memory_space<smem>>, %arg2: memref<8x256xf32, #tpu.memory_space<vmem>>, %arg3: memref<8x1xf32, #tpu.memory_space<vmem>>) attributes {dimension_semantics = [#tpu.dimension_semantics<parallel>], iteration_bounds = array<i64: 1>, scalar_prefetch = 1 : i64, scratch_operands = 0 : i64, tpu.core_type = #tpu.core_type<tc>, window_params = [{transform_indices = @transform_0, window_bounds = array<i64: 8, 256>}, {transform_indices = @transform_1, window_bounds = array<i64: 8, 1>}]} {
    %c0 = arith.constant 0 : index
    %0 = memref.load %arg1[%c0] : memref<1xf32, #tpu.memory_space<smem>>
    %cst = arith.constant 1.000000e+00 : f32
    %1 = arith.divf %cst, %0 : f32
    %c0_0 = arith.constant 0 : index
    %c0_1 = arith.constant 0 : index
    %2 = vector.load %arg2[%c0_0, %c0_1] : memref<8x256xf32, #tpu.memory_space<vmem>>, vector<8x256xf32>
    %cst_2 = arith.constant 9.99999997E-7 : f32
    %3 = vector.broadcast %cst_2 : f32 to vector<8x256xf32>
    %4 = arith.maximumf %2, %3 : vector<8x256xf32>
    %5 = math.log %4 : vector<8x256xf32>
    %6 = vector.broadcast %0 : f32 to vector<8x256xf32>
    %7 = arith.mulf %6, %5 : vector<8x256xf32>
    %8 = math.exp %7 : vector<8x256xf32>
    %cst_3 = arith.constant dense<0.000000e+00> : vector<8xf32>
    %9 = vector.multi_reduction <add>, %8, %cst_3 [1] : vector<8x256xf32> to vector<8xf32>
    %10 = vector.shape_cast %9 : vector<8xf32> to vector<8x1xf32>
    %cst_4 = arith.constant 2.560000e+02 : f32
    %11 = vector.broadcast %cst_4 : f32 to vector<8x1xf32>
    %12 = arith.divf %10, %11 : vector<8x1xf32>
    %13 = math.log %12 : vector<8x1xf32>
    %14 = vector.broadcast %1 : f32 to vector<8x1xf32>
    %15 = arith.mulf %13, %14 : vector<8x1xf32>
    %16 = math.exp %15 : vector<8x1xf32>
    %c0_5 = arith.constant 0 : index
    %c0_6 = arith.constant 0 : index
    %17 = vector.load %arg3[%c0_5, %c0_6] : memref<8x1xf32, #tpu.memory_space<vmem>>, vector<8x1xf32>
    tpu.vector_store %arg3[%c0_5, %c0_6], %16 {strides = array<i32>} : memref<8x1xf32, #tpu.memory_space<vmem>>, vector<8x1xf32>,
    return
  }
  func.func @transform_0(%arg0: i32, %arg1: memref<1xf32, #tpu.memory_space<smem>>) -> (i32, i32) {
    %c0_i32 = arith.constant 0 : i32
    %c0_i32_0 = arith.constant 0 : i32
    return %arg0, %c0_i32 : i32, i32
  }
  func.func @transform_1(%arg0: i32, %arg1: memref<1xf32, #tpu.memory_space<smem>>) -> (i32, i32) {
    %c0_i32 = arith.constant 0 : i32
    %c0_i32_0 = arith.constant 0 : i32
    return %arg0, %c0_i32 : i32, i32
  }
}

</mosaic_0001>

<bundles_post_ra>
// kernel: tpu_custom_call.1
= control target key start
LH: loop header
LB: loop body
LE: loop exit
PB: predicated region body
PF: predicated region fallthrough
CT: control target
= control target key end

     0   :  { %8 = vsyncpa [#allocation5], 0  ;;  %s126_s12 = smov [#allocation4]   ;;  %s152_s0 = inlined_call_operand.<no memory space> [shape: f32[1], index: 0, kind: input, shape index: {}]   ;;  %s153_s1 = inlined_call_operand.hbm [shape: f32[8,256], index: 1, kind: input, shape index: {}]   ;;  %s154_s2 = inlined_call_operand.vmem [shape: f32[8,1], index: 2, kind: output, shape index: {}]  }
   0x1   :  { %s14_s11 = sshll.u32 %s153_s1, 4  ;;  %s16_s13 = sshll.u32 %s126_s12, 4  ;;  %s15_s11 = int_to_ptr.hbm [resolvable:$true] %s14_s11  ;;  %s17_s13 = int_to_ptr.vmem [resolvable:$true] %s16_s13 }
   0x2   :  { %19 = dma.hbm_to_vmem [thread:$0]  %s15_s11, 256, %s17_s13, [#allocation5]  }
   0x3   :  { %124 = dma.done.wait [#allocation5], 256  }
   0x4   :  { %125 = vsyncadd [#allocation5], 4294967040  ;;  %v25_v0 = vstv %s152_s0  ;;  %v41_v2 = vld [vmem:[#allocation4] sm:$0xff]  ;;  %v42_v3 = vld [vmem:[#allocation4 + $0x8] sm:$0xff]  ;;  %v127_v26 = vmov 256.0   ;;  %vm73_vm5 = vcmask 7168  }
   0x5   :  { %84 = vrcp.f32 %v25_v0  ;;  %v43_v4 = vmax.f32 %v41_v2, 1e-06  ;;  %v44_v5 = vmax.f32 %v42_v3, 1e-06  ;;  %vm31_vm0 = vweird.f32 %v25_v0 }
   0x6   :  { %v37_v7 = vand.u32 2147483648, %v25_v0  ;;  %v35_v9 = vand.u32 2147483647, %v25_v0 }
   0x7   :  { %86 = vlog2.f32 %v43_v4 }
   0x8   :  { %88 = vlog2.f32 %v44_v5  ;;  %v38_v11 = vor.u32 1.1754944e-38, %v37_v7  ;;  %vm36_vm3 = vcmp.eq.f32.partialorder %v35_v9, 8.507059e+37 }
   0xb   :  { %v85_v1 = vpop.eup %84 }
   0xc   :  { %v27_v6 = vmul.f32 %v85_v1, %v25_v0  ;;  %vm32_vm1 = vweird.f32 %v85_v1 }
   0xd   :  { %vm33_vm2 = vmor %vm31_vm0, %vm32_vm1  ;;  %v87_v13 = vpop.eup %86 }
   0xe   :  { %v28_v8 = vsub.f32 1.0, %v27_v6  ;;  %v89_v15 = vpop.eup %88  ;;  %v46_v16 = vmul.f32 0.6931472, %v87_v13 }
   0xf   :  { %v48_v18 = vmul.f32 0.6931472, %v89_v15 }
  0x10   :  { %v29_v10 = vmul.f32 %v85_v1, %v28_v8  ;;  %v50_v19 = vmul.f32 %v46_v16, %v25_v0 }
  0x11   :  { %v51_v20 = vmul.f32 %v48_v18, %v25_v0 }
  0x12   :  { %v30_v12 = vadd.f32 %v85_v1, %v29_v10  ;;  %v52_v21 = vmul.f32 1.442695, %v50_v19 }
  0x13   :  { %v54_v22 = vmul.f32 1.442695, %v51_v20 }
  0x14   :  { %v34_v14 = vsel %vm33_vm2, %v85_v1, %v30_v12  ;;  %90 = vpow2.f32 %v52_v21 }
  0x15   :  { %v39_v17 = vsel %vm36_vm3, %v38_v11, %v34_v14  ;;  %92 = vpow2.f32 %v54_v22 }
  0x16   :  { %80 = vpush %v39_v17  ;;  %94 = vrcp.f32 %v127_v26 }
  0x1a   :  { %v91_v23 = vpop.eup %90 }
  0x1b   :  { %v93_v24 = vpop.eup %92 }
  0x1c   :  { %v56_v25 = vadd.f32 %v93_v24, %v91_v23  ;;  %v95_v27 = vpop.eup %94 }
  0x1d   :  { %v60_v28 = vmul.f32 256.0, %v95_v27  ;;  %vm64_vm4 = vweird.f32 %v95_v27 }
  0x1e   :  { %57 = vadd.xlane.f32.xlu0 %v56_v25 }
  0x1f   :  { %v61_v29 = vsub.f32 1.0, %v60_v28 }
  0x21   :  { %v62_v30 = vmul.f32 %v95_v27, %v61_v29 }
  0x23   :  { %v63_v31 = vadd.f32 %v95_v27, %v62_v30 }
  0x25   :  { %v65_v32 = vsel %vm64_vm4, %v95_v27, %v63_v31 }
  0x47   :  { %s81_s0 = spop %80 }
  0x48   :  { %v69_v36 = vstv %s81_s0 }
  0x91   :  { %v58_v33 = vpop.xlane.xlu0 %57 }
  0x92   :  { %v66_v34 = vmul.f32 %v65_v32, %v58_v33 }
  0x94   :  { %96 = vlog2.f32 %v66_v34 }
  0x9a   :  { %v97_v35 = vpop.eup %96 }
  0x9b   :  { %v68_v37 = vmul.f32 0.6931472, %v97_v35 }
  0x9d   :  { %v70_v38 = vmul.f32 %v69_v36, %v68_v37 }
  0x9f   :  { %v71_v39 = vmul.f32 1.442695, %v70_v38 }
  0xa1   :  { %98 = vpow2.f32 %v71_v39 }
  0xa7   :  { %v99_v40 = vpop.eup %98 }
  0xa8   :  { %74 = vst.msk [vmem:[%s154_s2] sm:$0xff] %vm73_vm5, %v99_v40 }
  0xa9   :  { %79 = vsyncpa [#allocation5], 1 }

</bundles_post_ra>
